<compile_context>
chip_gen: v7x
topology: tpu7x:2x2x1
jax: 0.10.0
libtpu: 0.0.40
codegen_flags: <defaults>
</compile_context>

<pallas_src>
import functools

import jax
import jax.numpy as jnp
from jax.experimental import pallas as pl
from jax.experimental.pallas import tpu as pltpu


def _round_up(x, m):
    return ((x + m - 1) // m) * m


def _pick_l2_tile(l2_pad, w_pad, rows, in_bytes, budget_bytes=24 * 1024 * 1024):
    """Largest 128-aligned L2 tile whose double-buffered working set (resident X +
    one wres tile + one output tile) fits `budget_bytes`, preferring an even number
    of tiles so the parallel L2 grid axis splits evenly across v7x's two TensorCores.
    """
    n = l2_pad // 128
    for n_tiles in range(1, n + 1):           # ascending -> prefer fewest / largest tiles
        if n % n_tiles:
            continue
        if n_tiles > 1 and n_tiles % 2:
            continue                          # even tile count for the 2-TC megacore split
        tile = (n // n_tiles) * 128
        need = 2 * (rows * w_pad * in_bytes + w_pad * tile * in_bytes
                    + rows * tile * 4 + tile * 4)
        if need <= budget_bytes:
            return tile
    return 128


# ----------------------------- Pallas kernels ------------------------------ #

def _residual_kernel(x_ref, w_ref, bres_ref, out_ref):
    """res_T tile = X_bc @ wres_T[:, tile] + bres[tile].

    X_bc (all batches folded into rows, bf16) is VMEM-resident across the whole grid
    (constant index_map), so it is streamed from HBM exactly once; each grid step
    streams one (w_pad, l2_tile) bf16 slice of wres^T (a multi-MB DMA burst at real
    sizes) and produces the full (R, l2_tile) lane-dense f32 output tile in a single
    MXU pass.  No reduction grid axis, no scratch accumulator, no pl.when.
    """
    out_ref[...] = (
        jnp.dot(x_ref[...], w_ref[...], preferred_element_type=jnp.float32)
        + bres_ref[...])


def _tcn_fc_kernel(xe_ref, xo_ref, res_ref, w1_ref, b1_ref, w2_ref, b2_ref,
                   fcw_ref, fcb_ref, out_ref, *, BT, L1, L2, n_classes):
    """Fused TCN (conv1 s=2 + ReLU + conv2 d=2 + ReLU) + residual add + Linear +
    Sigmoid for a block of BT batch elements (channel-major per batch: lane dim = L)."""
    for t in range(BT):                                  # static unroll over the batch tile
        xe = xe_ref[t]                                   # (C, L1+1) even-phase x^T
        xo = xo_ref[t]                                   # (C, L1)   odd-phase  x^T

        # conv1: k=3, stride=2.  The stride-2 taps are the even/odd phases of x.
        h1 = jnp.dot(w1_ref[0], xe[:, 0:L1], preferred_element_type=jnp.float32)
        h1 = h1 + jnp.dot(w1_ref[1], xo, preferred_element_type=jnp.float32)
        h1 = h1 + jnp.dot(w1_ref[2], xe[:, 1:1 + L1], preferred_element_type=jnp.float32)
        h1 = jnp.maximum(h1 + b1_ref[...], 0.0)
        # TODO(synk): nn.Dropout(0.2) is eval-mode identity here; training RNG mask not implemented.

        # conv2: k=3, dilation=2.  Dilated taps are lane-shifted slices of h1 (h1 is
        # produced in-kernel, so these shifts cannot be hoisted to the wrapper).
        h2 = jnp.dot(w2_ref[0], h1[:, 0:L2], preferred_element_type=jnp.float32)
        h2 = h2 + jnp.dot(w2_ref[1], h1[:, 2:2 + L2], preferred_element_type=jnp.float32)
        h2 = h2 + jnp.dot(w2_ref[2], h1[:, 4:4 + L2], preferred_element_type=jnp.float32)
        h2 = jnp.maximum(h2 + b2_ref[...], 0.0)

        # Residual add (residual already contains bres); stays channel-major.
        y_t = h2 + res_ref[t][:, 0:L2]                   # (C, L2) == y[b].T

        # Fused Linear + Sigmoid.  fcw is pre-permuted to (n_classes, C, L2) so the
        # torch flatten order is honoured; reduce over the lane (L2) axis first, then
        # over C, add the bias row, sigmoid.  (No iota/where select passes.)
        prod = fcw_ref[...] * y_t[None, :, :]            # (n_classes, C, L2)
        s = jnp.sum(prod, axis=-1)                       # (n_classes, C)   lane reduce
        logits = jnp.sum(s, axis=-1).reshape(1, n_classes) + fcb_ref[...]
        out_ref[pl.ds(t, 1), :] = jax.nn.sigmoid(logits)


# ------------------------------- wrapper ----------------------------------- #

def baseline_net_forward(x, p, *, batch_tile=8, residual_in_bf16=True):
    """x: (B, W, C) float32.  p: torch-layout parameters.  Returns sigmoid logits."""
    B, W, C = x.shape
    L1 = (W - 3) // 2 + 1          # conv1: k=3, stride=2, pad=0
    L2 = L1 - 4                    # conv2: k=3, dilation=2, stride=1, pad=0
    n_classes = p["fc_b"].shape[0]

    BT = max(1, min(batch_tile, B))
    nB = -(-B // BT)
    B_pad = nB * BT
    R = B_pad * C                  # rows of the batch-folded residual matmul

    w_pad = _round_up(W, 128)
    l2_pad = _round_up(L2, 128)
    in_bytes = 2 if residual_in_bf16 else 4
    l2_tile = _pick_l2_tile(l2_pad, w_pad, R, in_bytes)

    # ---- glue: layout massaging (transposes / zero pads / casts, no real compute) ----
    xt = jnp.transpose(x, (0, 2, 1))                              # (B, C, W)
    if B_pad != B:
        xt = jnp.pad(xt, ((0, B_pad - B), (0, 0), (0, 0)))        # pad batch with zeros

    rdt = jnp.bfloat16 if residual_in_bf16 else x.dtype
    x_bc = xt.reshape(R, W)                                       # row = b*C + c
    x_bc = jnp.pad(x_bc, ((0, 0), (0, w_pad - W))).astype(rdt)
    wres_t = jnp.pad(jnp.transpose(p["wres"][:, :, 0], (1, 0)),   # (W, L2) zero-padded
                     ((0, w_pad - W), (0, l2_pad - L2))).astype(rdt)
    bres_row = jnp.pad(p["bres"].reshape(1, L2), ((0, 0), (0, l2_pad - L2)))

    # Double-buffered working-set estimate -> always set vmem_limit_bytes (>=32 MiB)
    # so v5e's 16 MiB scoped default never constrains the tile plan.
    need = 2 * (R * w_pad * in_bytes + w_pad * l2_tile * in_bytes
                + R * l2_tile * 4 + l2_tile * 4)
    vmem_limit = max(32 * 1024 * 1024, int(need * 1.25))

    # ---- kernel R: residual 1x1 conv, X resident, wres streamed once, bf16 operands ----
    res_t = pl.pallas_call(
        _residual_kernel,
        out_shape=jax.ShapeDtypeStruct((R, l2_pad), jnp.float32),
        grid=(l2_pad // l2_tile,),
        in_specs=[
            pl.BlockSpec((R, w_pad), lambda li: (0, 0)),          # X: resident, DMA'd once
            pl.BlockSpec((w_pad, l2_tile), lambda li: (0, li)),   # wres^T tile (big burst)
            pl.BlockSpec((1, l2_tile), lambda li: (0, li)),       # bres (lane dense)
        ],
        out_specs=pl.BlockSpec((R, l2_tile), lambda li: (0, li)),
        compiler_params=pltpu.CompilerParams(
            dimension_semantics=("parallel",),
            vmem_limit_bytes=vmem_limit),
    )(x_bc, wres_t, bres_row)

    # ---- glue for the fused, batch-tiled TCN + FC kernel ----
    xe = xt[:, :, 0:2 * L1 + 1:2].reshape(nB, BT, C, L1 + 1)      # even phase of x^T
    xo = xt[:, :, 1:2 * L1:2].reshape(nB, BT, C, L1)              # odd  phase of x^T
    res4 = res_t.reshape(nB, BT, C, l2_pad)                       # free reshape (row = b*C + c)
    w1_t = jnp.transpose(p["w1"], (2, 0, 1))                      # (k, Cout, Cin)
    w2_t = jnp.transpose(p["w2"], (2, 0, 1))
    b1_c = p["b1"].reshape(C, 1)
    b2_c = p["b2"].reshape(C, 1)
    # fc weight permuted so that fcw3[o, c, l] == fc_w[o, l*C + c] (torch flatten order).
    fcw3 = jnp.transpose(p["fc_w"].reshape(n_classes, L2, C), (0, 2, 1))
    fcb = p["fc_b"].reshape(1, n_classes)

    kernel_t = functools.partial(_tcn_fc_kernel, BT=BT, L1=L1, L2=L2,
                                 n_classes=n_classes)
    out = pl.pallas_call(
        kernel_t,
        out_shape=jax.ShapeDtypeStruct((nB, BT, n_classes), jnp.float32),
        grid=(nB,),
        in_specs=[
            pl.BlockSpec((None, BT, C, L1 + 1), lambda g: (g, 0, 0, 0)),   # xe
            pl.BlockSpec((None, BT, C, L1), lambda g: (g, 0, 0, 0)),       # xo
            pl.BlockSpec((None, BT, C, l2_pad), lambda g: (g, 0, 0, 0)),   # residual rows
            pl.BlockSpec((3, C, C), lambda g: (0, 0, 0)),                  # w1 taps
            pl.BlockSpec((C, 1), lambda g: (0, 0)),                        # b1
            pl.BlockSpec((3, C, C), lambda g: (0, 0, 0)),                  # w2 taps
            pl.BlockSpec((C, 1), lambda g: (0, 0)),                        # b2
            pl.BlockSpec((n_classes, C, L2), lambda g: (0, 0, 0)),         # fc weight
            pl.BlockSpec((1, n_classes), lambda g: (0, 0)),                # fc bias
        ],
        out_specs=pl.BlockSpec((None, BT, n_classes), lambda g: (g, 0, 0)),
        compiler_params=pltpu.CompilerParams(dimension_semantics=("parallel",)),
    )(xe, xo, res4, w1_t, b1_c, w2_t, b2_c, fcw3, fcb)
    return out.reshape(B_pad, n_classes)[:B]


# --------------------------- parameter creation ----------------------------- #

def init_params(key, C, W, n_classes):
    """Deterministic synthetic parameters in torch layouts (Conv1d: (Cout, Cin, K))."""
    L1 = (W - 3) // 2 + 1
    L2 = L1 - 4
    ks = jax.random.split(key, 8)

    def u(k, shape, fan_in):
        bound = 1.0 / jnp.sqrt(jnp.float32(fan_in))
        return jax.random.uniform(k, shape, jnp.float32, -bound, bound)

    # weight_norm(Conv1d): w = g * v / ||v||_(Cin,K), with g initialised to ||v||.
    def weight_norm(v):
        norm = jnp.sqrt(jnp.sum(v * v, axis=(1, 2), keepdims=True))
        g = norm
        return g * v / norm

    w1 = weight_norm(u(ks[0], (C, C, 3), C * 3))
    b1 = u(ks[1], (C,), C * 3)
    w2 = weight_norm(u(ks[2], (C, C, 3), C * 3))
    b2 = u(ks[3], (C,), C * 3)
    wres = u(ks[4], (L2, W, 1), W)                 # Conv1d(W, L2, kernel_size=1)
    bres = u(ks[5], (L2,), W)
    fc_w = u(ks[6], (n_classes, L2 * C), L2 * C)   # nn.Linear(L2*C, n_classes)
    fc_b = u(ks[7], (n_classes,), L2 * C)
    return {"w1": w1, "b1": b1, "w2": w2, "b2": b2,
            "wres": wres, "bres": bres, "fc_w": fc_w, "fc_b": fc_b}


# --------------------------- pure-JAX reference ----------------------------- #

def reference_forward(x, p):
    B, W, C = x.shape
    xt = jnp.transpose(x, (0, 2, 1))                              # (B, C, W)
    h1 = jax.lax.conv_general_dilated(
        xt, p["w1"], window_strides=(2,), padding="VALID",
        dimension_numbers=("NCH", "OIH", "NCH")) + p["b1"][None, :, None]
    h1 = jax.nn.relu(h1)
    h2 = jax.lax.conv_general_dilated(
        h1, p["w2"], window_strides=(1,), padding="VALID", rhs_dilation=(2,),
        dimension_numbers=("NCH", "OIH", "NCH")) + p["b2"][None, :, None]
    h2 = jax.nn.relu(h2)
    # residual conv treats x (B, W, C) as NCL with "channels" = W, "length" = C.
    res = jax.lax.conv_general_dilated(
        x, p["wres"], window_strides=(1,), padding="VALID",
        dimension_numbers=("NCH", "OIH", "NCH")) + p["bres"][None, :, None]
    y = jnp.transpose(h2, (0, 2, 1)) + res                        # (B, L2, C)
    flat = y.reshape(B, -1)
    return jax.nn.sigmoid(flat @ p["fc_w"].T + p["fc_b"][None, :])


# ---------------------------------- main ------------------------------------ #

if __name__ == "__main__":
    # Small stand-ins for (B, 4500, 12, out_classes); B=3 with batch_tile=2 also
    # exercises the batch-padding path and a multi-step kernel-T grid.
    B, W, C, n_classes = 3, 64, 8, 5
    key = jax.random.PRNGKey(0)
    kx, kp = jax.random.split(key)
    x = jax.random.normal(kx, (B, W, C), jnp.float32)
    params = init_params(kp, C, W, n_classes)

    ref = reference_forward(x, params)

    # f32 residual path: tight parity with the pure-JAX reference.
    fwd_f32 = jax.jit(functools.partial(baseline_net_forward,
                                        batch_tile=2, residual_in_bf16=False))
    out_f32 = jax.block_until_ready(fwd_f32(x, params))
    assert out_f32.shape == (B, n_classes), out_f32.shape
    assert jnp.allclose(out_f32, ref, atol=3e-5, rtol=3e-5), (out_f32, ref)

    # bf16-streamed residual (the performance configuration): relaxed tolerance,
    # as called out in the perf review.
    fwd = jax.jit(functools.partial(baseline_net_forward, batch_tile=2))
    out = jax.block_until_ready(fwd(x, params))
    assert out.shape == (B, n_classes), out.shape
    assert jnp.allclose(out, ref, atol=2e-2, rtol=2e-2), (out, ref)

    print("KERNEL_OK")
</pallas_src>

<mosaic_0001>
module attributes {stable_mosaic.version = 11 : i64} {
  func.func @_tcn_fc_kernel(%arg0: i32, %arg1: memref<1x2x8x32xf32, #tpu.memory_space<vmem>>, %arg2: memref<1x2x8x31xf32, #tpu.memory_space<vmem>>, %arg3: memref<1x2x8x128xf32, #tpu.memory_space<vmem>>, %arg4: memref<3x8x8xf32, #tpu.memory_space<vmem>>, %arg5: memref<8x1xf32, #tpu.memory_space<vmem>>, %arg6: memref<3x8x8xf32, #tpu.memory_space<vmem>>, %arg7: memref<8x1xf32, #tpu.memory_space<vmem>>, %arg8: memref<5x8x27xf32, #tpu.memory_space<vmem>>, %arg9: memref<1x5xf32, #tpu.memory_space<vmem>>, %arg10: memref<1x2x5xf32, #tpu.memory_space<vmem>>) attributes {dimension_semantics = [#tpu.dimension_semantics<parallel>], iteration_bounds = array<i64: 2>, scalar_prefetch = 0 : i64, scratch_operands = 0 : i64, tpu.core_type = #tpu.core_type<tc>, window_params = [{transform_indices = @transform_0, window_bounds = array<i64: 1, 2, 8, 32>}, {transform_indices = @transform_1, window_bounds = array<i64: 1, 2, 8, 31>}, {transform_indices = @transform_2, window_bounds = array<i64: 1, 2, 8, 128>}, {pipeline_mode = #tpu.pipeline_mode<synchronous>, transform_indices = @transform_3, window_bounds = array<i64: 3, 8, 8>}, {pipeline_mode = #tpu.pipeline_mode<synchronous>, transform_indices = @transform_4, window_bounds = array<i64: 8, 1>}, {pipeline_mode = #tpu.pipeline_mode<synchronous>, transform_indices = @transform_5, window_bounds = array<i64: 3, 8, 8>}, {pipeline_mode = #tpu.pipeline_mode<synchronous>, transform_indices = @transform_6, window_bounds = array<i64: 8, 1>}, {pipeline_mode = #tpu.pipeline_mode<synchronous>, transform_indices = @transform_7, window_bounds = array<i64: 5, 8, 27>}, {pipeline_mode = #tpu.pipeline_mode<synchronous>, transform_indices = @transform_8, window_bounds = array<i64: 1, 5>}, {transform_indices = @transform_9, window_bounds = array<i64: 1, 2, 5>}]} {
    %c0 = arith.constant 0 : index
    %c0_0 = arith.constant 0 : index
    %c0_1 = arith.constant 0 : index
    %c0_2 = arith.constant 0 : index
    %0 = vector.load %arg1[%c0, %c0_0, %c0_1, %c0_2] : memref<1x2x8x32xf32, #tpu.memory_space<vmem>>, vector<1x1x8x32xf32>
    %1 = vector.shape_cast %0 : vector<1x1x8x32xf32> to vector<8x32xf32>
    %c0_3 = arith.constant 0 : index
    %c0_4 = arith.constant 0 : index
    %c0_5 = arith.constant 0 : index
    %c0_6 = arith.constant 0 : index
    %2 = vector.load %arg2[%c0_3, %c0_4, %c0_5, %c0_6] : memref<1x2x8x31xf32, #tpu.memory_space<vmem>>, vector<1x1x8x31xf32>
    %3 = vector.shape_cast %2 : vector<1x1x8x31xf32> to vector<8x31xf32>
    %c0_7 = arith.constant 0 : index
    %c0_8 = arith.constant 0 : index
    %c0_9 = arith.constant 0 : index
    %4 = vector.load %arg4[%c0_7, %c0_8, %c0_9] : memref<3x8x8xf32, #tpu.memory_space<vmem>>, vector<1x8x8xf32>
    %5 = vector.shape_cast %4 : vector<1x8x8xf32> to vector<8x8xf32>
    %6 = vector.extract_strided_slice %1 {offsets = [0, 0], sizes = [8, 31], strides = [1, 1]} : vector<8x32xf32> to vector<8x31xf32>
    %cst = arith.constant dense<0.000000e+00> : vector<8x31xf32>
    %7 = tpu.matmul %5, %6, %cst {dimension_numbers = #tpu.dot_dimension_numbers<[1], [0], [0], [1], [0, 0, 1, 1], [], []>} : vector<8x8xf32>, vector<8x31xf32>, vector<8x31xf32> -> vector<8x31xf32>
    %c1 = arith.constant 1 : index
    %c0_10 = arith.constant 0 : index
    %c0_11 = arith.constant 0 : index
    %8 = vector.load %arg4[%c1, %c0_10, %c0_11] : memref<3x8x8xf32, #tpu.memory_space<vmem>>, vector<1x8x8xf32>
    %9 = vector.shape_cast %8 : vector<1x8x8xf32> to vector<8x8xf32>
    %cst_12 = arith.constant dense<0.000000e+00> : vector<8x31xf32>
    %10 = tpu.matmul %9, %3, %cst_12 {dimension_numbers = #tpu.dot_dimension_numbers<[1], [0], [0], [1], [0, 0, 1, 1], [], []>} : vector<8x8xf32>, vector<8x31xf32>, vector<8x31xf32> -> vector<8x31xf32>
    %11 = arith.addf %7, %10 : vector<8x31xf32>
    %c2 = arith.constant 2 : index
    %c0_13 = arith.constant 0 : index
    %c0_14 = arith.constant 0 : index
    %12 = vector.load %arg4[%c2, %c0_13, %c0_14] : memref<3x8x8xf32, #tpu.memory_space<vmem>>, vector<1x8x8xf32>
    %13 = vector.shape_cast %12 : vector<1x8x8xf32> to vector<8x8xf32>
    %14 = vector.extract_strided_slice %1 {offsets = [0, 1], sizes = [8, 31], strides = [1, 1]} : vector<8x32xf32> to vector<8x31xf32>
    %cst_15 = arith.constant dense<0.000000e+00> : vector<8x31xf32>
    %15 = tpu.matmul %13, %14, %cst_15 {dimension_numbers = #tpu.dot_dimension_numbers<[1], [0], [0], [1], [0, 0, 1, 1], [], []>} : vector<8x8xf32>, vector<8x31xf32>, vector<8x31xf32> -> vector<8x31xf32>
    %16 = arith.addf %11, %15 : vector<8x31xf32>
    %c0_16 = arith.constant 0 : index
    %c0_17 = arith.constant 0 : index
    %17 = vector.load %arg5[%c0_16, %c0_17] : memref<8x1xf32, #tpu.memory_space<vmem>>, vector<8x1xf32>
    %18 = vector.broadcast %17 : vector<8x1xf32> to vector<8x31xf32>
    %19 = arith.addf %16, %18 : vector<8x31xf32>
    %cst_18 = arith.constant 0.000000e+00 : f32
    %20 = vector.broadcast %cst_18 : f32 to vector<8x31xf32>
    %21 = arith.maximumf %19, %20 : vector<8x31xf32>
    %c0_19 = arith.constant 0 : index
    %c0_20 = arith.constant 0 : index
    %c0_21 = arith.constant 0 : index
    %22 = vector.load %arg6[%c0_19, %c0_20, %c0_21] : memref<3x8x8xf32, #tpu.memory_space<vmem>>, vector<1x8x8xf32>
    %23 = vector.shape_cast %22 : vector<1x8x8xf32> to vector<8x8xf32>
    %24 = vector.extract_strided_slice %21 {offsets = [0, 0], sizes = [8, 27], strides = [1, 1]} : vector<8x31xf32> to vector<8x27xf32>
    %cst_22 = arith.constant dense<0.000000e+00> : vector<8x27xf32>
    %25 = tpu.matmul %23, %24, %cst_22 {dimension_numbers = #tpu.dot_dimension_numbers<[1], [0], [0], [1], [0, 0, 1, 1], [], []>} : vector<8x8xf32>, vector<8x27xf32>, vector<8x27xf32> -> vector<8x27xf32>
    %c1_23 = arith.constant 1 : index
    %c0_24 = arith.constant 0 : index
    %c0_25 = arith.constant 0 : index
    %26 = vector.load %arg6[%c1_23, %c0_24, %c0_25] : memref<3x8x8xf32, #tpu.memory_space<vmem>>, vector<1x8x8xf32>
    %27 = vector.shape_cast %26 : vector<1x8x8xf32> to vector<8x8xf32>
    %28 = vector.extract_strided_slice %21 {offsets = [0, 2], sizes = [8, 27], strides = [1, 1]} : vector<8x31xf32> to vector<8x27xf32>
    %cst_26 = arith.constant dense<0.000000e+00> : vector<8x27xf32>
    %29 = tpu.matmul %27, %28, %cst_26 {dimension_numbers = #tpu.dot_dimension_numbers<[1], [0], [0], [1], [0, 0, 1, 1], [], []>} : vector<8x8xf32>, vector<8x27xf32>, vector<8x27xf32> -> vector<8x27xf32>
    %30 = arith.addf %25, %29 : vector<8x27xf32>
    %c2_27 = arith.constant 2 : index
    %c0_28 = arith.constant 0 : index
    %c0_29 = arith.constant 0 : index
    %31 = vector.load %arg6[%c2_27, %c0_28, %c0_29] : memref<3x8x8xf32, #tpu.memory_space<vmem>>, vector<1x8x8xf32>
    %32 = vector.shape_cast %31 : vector<1x8x8xf32> to vector<8x8xf32>
    %33 = vector.extract_strided_slice %21 {offsets = [0, 4], sizes = [8, 27], strides = [1, 1]} : vector<8x31xf32> to vector<8x27xf32>
    %cst_30 = arith.constant dense<0.000000e+00> : vector<8x27xf32>
    %34 = tpu.matmul %32, %33, %cst_30 {dimension_numbers = #tpu.dot_dimension_numbers<[1], [0], [0], [1], [0, 0, 1, 1], [], []>} : vector<8x8xf32>, vector<8x27xf32>, vector<8x27xf32> -> vector<8x27xf32>
    %35 = arith.addf %30, %34 : vector<8x27xf32>
    %c0_31 = arith.constant 0 : index
    %c0_32 = arith.constant 0 : index
    %36 = vector.load %arg7[%c0_31, %c0_32] : memref<8x1xf32, #tpu.memory_space<vmem>>, vector<8x1xf32>
    %37 = vector.broadcast %36 : vector<8x1xf32> to vector<8x27xf32>
    %38 = arith.addf %35, %37 : vector<8x27xf32>
    %cst_33 = arith.constant 0.000000e+00 : f32
    %39 = vector.broadcast %cst_33 : f32 to vector<8x27xf32>
    %40 = arith.maximumf %38, %39 : vector<8x27xf32>
    %c0_34 = arith.constant 0 : index
    %c0_35 = arith.constant 0 : index
    %c0_36 = arith.constant 0 : index
    %c0_37 = arith.constant 0 : index
    %41 = vector.load %arg3[%c0_34, %c0_35, %c0_36, %c0_37] : memref<1x2x8x128xf32, #tpu.memory_space<vmem>>, vector<1x1x8x128xf32>
    %42 = vector.shape_cast %41 : vector<1x1x8x128xf32> to vector<8x128xf32>
    %43 = vector.extract_strided_slice %42 {offsets = [0, 0], sizes = [8, 27], strides = [1, 1]} : vector<8x128xf32> to vector<8x27xf32>
    %44 = arith.addf %40, %43 : vector<8x27xf32>
    %c0_38 = arith.constant 0 : index
    %c0_39 = arith.constant 0 : index
    %c0_40 = arith.constant 0 : index
    %45 = vector.load %arg8[%c0_38, %c0_39, %c0_40] : memref<5x8x27xf32, #tpu.memory_space<vmem>>, vector<5x8x27xf32>
    %46 = vector.shape_cast %44 : vector<8x27xf32> to vector<1x8x27xf32>
    %47 = vector.broadcast %46 : vector<1x8x27xf32> to vector<5x8x27xf32>
    %48 = arith.mulf %45, %47 : vector<5x8x27xf32>
    %cst_41 = arith.constant dense<0.000000e+00> : vector<5x8xf32>
    %49 = vector.multi_reduction <add>, %48, %cst_41 [2] : vector<5x8x27xf32> to vector<5x8xf32>
    %cst_42 = arith.constant dense<0.000000e+00> : vector<5xf32>
    %50 = vector.multi_reduction <add>, %49, %cst_42 [1] : vector<5x8xf32> to vector<5xf32>
    %51 = vector.shape_cast %50 : vector<5xf32> to vector<1x5xf32>
    %c0_43 = arith.constant 0 : index
    %c0_44 = arith.constant 0 : index
    %52 = vector.load %arg9[%c0_43, %c0_44] : memref<1x5xf32, #tpu.memory_space<vmem>>, vector<1x5xf32>
    %53 = arith.addf %51, %52 : vector<1x5xf32>
    %54 = arith.negf %53 : vector<1x5xf32>
    %55 = math.exp %54 : vector<1x5xf32>
    %cst_45 = arith.constant 1.000000e+00 : f32
    %56 = vector.broadcast %cst_45 : f32 to vector<1x5xf32>
    %57 = arith.addf %56, %55 : vector<1x5xf32>
    %58 = arith.divf %56, %57 : vector<1x5xf32>
    %c0_46 = arith.constant 0 : index
    %c0_47 = arith.constant 0 : index
    %c0_48 = arith.constant 0 : index
    %59 = vector.load %arg10[%c0_46, %c0_47, %c0_48] : memref<1x2x5xf32, #tpu.memory_space<vmem>>, vector<1x1x5xf32>
    %60 = vector.shape_cast %59 : vector<1x1x5xf32> to vector<1x5xf32>
    %61 = vector.shape_cast %58 : vector<1x5xf32> to vector<1x1x5xf32>
    tpu.vector_store %arg10[%c0_46, %c0_47, %c0_48], %61 {strides = array<i32>} : memref<1x2x5xf32, #tpu.memory_space<vmem>>, vector<1x1x5xf32>,
    %c0_49 = arith.constant 0 : index
    %c1_50 = arith.constant 1 : index
    %c0_51 = arith.constant 0 : index
    %c0_52 = arith.constant 0 : index
    %62 = vector.load %arg1[%c0_49, %c1_50, %c0_51, %c0_52] : memref<1x2x8x32xf32, #tpu.memory_space<vmem>>, vector<1x1x8x32xf32>
    %63 = vector.shape_cast %62 : vector<1x1x8x32xf32> to vector<8x32xf32>
    %c0_53 = arith.constant 0 : index
    %c1_54 = arith.constant 1 : index
    %c0_55 = arith.constant 0 : index
    %c0_56 = arith.constant 0 : index
    %64 = vector.load %arg2[%c0_53, %c1_54, %c0_55, %c0_56] : memref<1x2x8x31xf32, #tpu.memory_space<vmem>>, vector<1x1x8x31xf32>
    %65 = vector.shape_cast %64 : vector<1x1x8x31xf32> to vector<8x31xf32>
    %c0_57 = arith.constant 0 : index
    %c0_58 = arith.constant 0 : index
    %c0_59 = arith.constant 0 : index
    %66 = vector.load %arg4[%c0_57, %c0_58, %c0_59] : memref<3x8x8xf32, #tpu.memory_space<vmem>>, vector<1x8x8xf32>
    %67 = vector.shape_cast %66 : vector<1x8x8xf32> to vector<8x8xf32>
    %68 = vector.extract_strided_slice %63 {offsets = [0, 0], sizes = [8, 31], strides = [1, 1]} : vector<8x32xf32> to vector<8x31xf32>
    %cst_60 = arith.constant dense<0.000000e+00> : vector<8x31xf32>
    %69 = tpu.matmul %67, %68, %cst_60 {dimension_numbers = #tpu.dot_dimension_numbers<[1], [0], [0], [1], [0, 0, 1, 1], [], []>} : vector<8x8xf32>, vector<8x31xf32>, vector<8x31xf32> -> vector<8x31xf32>
    %c1_61 = arith.constant 1 : index
    %c0_62 = arith.constant 0 : index
    %c0_63 = arith.constant 0 : index
    %70 = vector.load %arg4[%c1_61, %c0_62, %c0_63] : memref<3x8x8xf32, #tpu.memory_space<vmem>>, vector<1x8x8xf32>
    %71 = vector.shape_cast %70 : vector<1x8x8xf32> to vector<8x8xf32>
    %cst_64 = arith.constant dense<0.000000e+00> : vector<8x31xf32>
    %72 = tpu.matmul %71, %65, %cst_64 {dimension_numbers = #tpu.dot_dimension_numbers<[1], [0], [0], [1], [0, 0, 1, 1], [], []>} : vector<8x8xf32>, vector<8x31xf32>, vector<8x31xf32> -> vector<8x31xf32>
    %73 = arith.addf %69, %72 : vector<8x31xf32>
    %c2_65 = arith.constant 2 : index
    %c0_66 = arith.constant 0 : index
    %c0_67 = arith.constant 0 : index
    %74 = vector.load %arg4[%c2_65, %c0_66, %c0_67] : memref<3x8x8xf32, #tpu.memory_space<vmem>>, vector<1x8x8xf32>
    %75 = vector.shape_cast %74 : vector<1x8x8xf32> to vector<8x8xf32>
    %76 = vector.extract_strided_slice %63 {offsets = [0, 1], sizes = [8, 31], strides = [1, 1]} : vector<8x32xf32> to vector<8x31xf32>
    %cst_68 = arith.constant dense<0.000000e+00> : vector<8x31xf32>
    %77 = tpu.matmul %75, %76, %cst_68 {dimension_numbers = #tpu.dot_dimension_numbers<[1], [0], [0], [1], [0, 0, 1, 1], [], []>} : vector<8x8xf32>, vector<8x31xf32>, vector<8x31xf32> -> vector<8x31xf32>
    %78 = arith.addf %73, %77 : vector<8x31xf32>
    %c0_69 = arith.constant 0 : index
    %c0_70 = arith.constant 0 : index
    %79 = vector.load %arg5[%c0_69, %c0_70] : memref<8x1xf32, #tpu.memory_space<vmem>>, vector<8x1xf32>
    %80 = vector.broadcast %79 : vector<8x1xf32> to vector<8x31xf32>
    %81 = arith.addf %78, %80 : vector<8x31xf32>
    %cst_71 = arith.constant 0.000000e+00 : f32
    %82 = vector.broadcast %cst_71 : f32 to vector<8x31xf32>
    %83 = arith.maximumf %81, %82 : vector<8x31xf32>
    %c0_72 = arith.constant 0 : index
    %c0_73 = arith.constant 0 : index
    %c0_74 = arith.constant 0 : index
    %84 = vector.load %arg6[%c0_72, %c0_73, %c0_74] : memref<3x8x8xf32, #tpu.memory_space<vmem>>, vector<1x8x8xf32>
    %85 = vector.shape_cast %84 : vector<1x8x8xf32> to vector<8x8xf32>
    %86 = vector.extract_strided_slice %83 {offsets = [0, 0], sizes = [8, 27], strides = [1, 1]} : vector<8x31xf32> to vector<8x27xf32>
    %cst_75 = arith.constant dense<0.000000e+00> : vector<8x27xf32>
    %87 = tpu.matmul %85, %86, %cst_75 {dimension_numbers = #tpu.dot_dimension_numbers<[1], [0], [0], [1], [0, 0, 1, 1], [], []>} : vector<8x8xf32>, vector<8x27xf32>, vector<8x27xf32> -> vector<8x27xf32>
    %c1_76 = arith.constant 1 : index
    %c0_77 = arith.constant 0 : index
    %c0_78 = arith.constant 0 : index
    %88 = vector.load %arg6[%c1_76, %c0_77, %c0_78] : memref<3x8x8xf32, #tpu.memory_space<vmem>>, vector<1x8x8xf32>
    %89 = vector.shape_cast %88 : vector<1x8x8xf32> to vector<8x8xf32>
    %90 = vector.extract_strided_slice %83 {offsets = [0, 2], sizes = [8, 27], strides = [1, 1]} : vector<8x31xf32> to vector<8x27xf32>
    %cst_79 = arith.constant dense<0.000000e+00> : vector<8x27xf32>
    %91 = tpu.matmul %89, %90, %cst_79 {dimension_numbers = #tpu.dot_dimension_numbers<[1], [0], [0], [1], [0, 0, 1, 1], [], []>} : vector<8x8xf32>, vector<8x27xf32>, vector<8x27xf32> -> vector<8x27xf32>
    %92 = arith.addf %87, %91 : vector<8x27xf32>
    %c2_80 = arith.constant 2 : index
    %c0_81 = arith.constant 0 : index
    %c0_82 = arith.constant 0 : index
    %93 = vector.load %arg6[%c2_80, %c0_81, %c0_82] : memref<3x8x8xf32, #tpu.memory_space<vmem>>, vector<1x8x8xf32>
    %94 = vector.shape_cast %93 : vector<1x8x8xf32> to vector<8x8xf32>
    %95 = vector.extract_strided_slice %83 {offsets = [0, 4], sizes = [8, 27], strides = [1, 1]} : vector<8x31xf32> to vector<8x27xf32>
    %cst_83 = arith.constant dense<0.000000e+00> : vector<8x27xf32>
    %96 = tpu.matmul %94, %95, %cst_83 {dimension_numbers = #tpu.dot_dimension_numbers<[1], [0], [0], [1], [0, 0, 1, 1], [], []>} : vector<8x8xf32>, vector<8x27xf32>, vector<8x27xf32> -> vector<8x27xf32>
    %97 = arith.addf %92, %96 : vector<8x27xf32>
    %c0_84 = arith.constant 0 : index
    %c0_85 = arith.constant 0 : index
    %98 = vector.load %arg7[%c0_84, %c0_85] : memref<8x1xf32, #tpu.memory_space<vmem>>, vector<8x1xf32>
    %99 = vector.broadcast %98 : vector<8x1xf32> to vector<8x27xf32>
    %100 = arith.addf %97, %99 : vector<8x27xf32>
    %cst_86 = arith.constant 0.000000e+00 : f32
    %101 = vector.broadcast %cst_86 : f32 to vector<8x27xf32>
    %102 = arith.maximumf %100, %101 : vector<8x27xf32>
    %c0_87 = arith.constant 0 : index
    %c1_88 = arith.constant 1 : index
    %c0_89 = arith.constant 0 : index
    %c0_90 = arith.constant 0 : index
    %103 = vector.load %arg3[%c0_87, %c1_88, %c0_89, %c0_90] : memref<1x2x8x128xf32, #tpu.memory_space<vmem>>, vector<1x1x8x128xf32>
    %104 = vector.shape_cast %103 : vector<1x1x8x128xf32> to vector<8x128xf32>
    %105 = vector.extract_strided_slice %104 {offsets = [0, 0], sizes = [8, 27], strides = [1, 1]} : vector<8x128xf32> to vector<8x27xf32>
    %106 = arith.addf %102, %105 : vector<8x27xf32>
    %c0_91 = arith.constant 0 : index
    %c0_92 = arith.constant 0 : index
    %c0_93 = arith.constant 0 : index
    %107 = vector.load %arg8[%c0_91, %c0_92, %c0_93] : memref<5x8x27xf32, #tpu.memory_space<vmem>>, vector<5x8x27xf32>
    %108 = vector.shape_cast %106 : vector<8x27xf32> to vector<1x8x27xf32>
    %109 = vector.broadcast %108 : vector<1x8x27xf32> to vector<5x8x27xf32>
    %110 = arith.mulf %107, %109 : vector<5x8x27xf32>
    %cst_94 = arith.constant dense<0.000000e+00> : vector<5x8xf32>
    %111 = vector.multi_reduction <add>, %110, %cst_94 [2] : vector<5x8x27xf32> to vector<5x8xf32>
    %cst_95 = arith.constant dense<0.000000e+00> : vector<5xf32>
    %112 = vector.multi_reduction <add>, %111, %cst_95 [1] : vector<5x8xf32> to vector<5xf32>
    %113 = vector.shape_cast %112 : vector<5xf32> to vector<1x5xf32>
    %c0_96 = arith.constant 0 : index
    %c0_97 = arith.constant 0 : index
    %114 = vector.load %arg9[%c0_96, %c0_97] : memref<1x5xf32, #tpu.memory_space<vmem>>, vector<1x5xf32>
    %115 = arith.addf %113, %114 : vector<1x5xf32>
    %116 = arith.negf %115 : vector<1x5xf32>
    %117 = math.exp %116 : vector<1x5xf32>
    %cst_98 = arith.constant 1.000000e+00 : f32
    %118 = vector.broadcast %cst_98 : f32 to vector<1x5xf32>
    %119 = arith.addf %118, %117 : vector<1x5xf32>
    %120 = arith.divf %118, %119 : vector<1x5xf32>
    %c0_99 = arith.constant 0 : index
    %c1_100 = arith.constant 1 : index
    %c0_101 = arith.constant 0 : index
    %121 = vector.load %arg10[%c0_99, %c1_100, %c0_101] : memref<1x2x5xf32, #tpu.memory_space<vmem>>, vector<1x1x5xf32>
    %122 = vector.shape_cast %121 : vector<1x1x5xf32> to vector<1x5xf32>
    %123 = vector.shape_cast %120 : vector<1x5xf32> to vector<1x1x5xf32>
    tpu.vector_store %arg10[%c0_99, %c1_100, %c0_101], %123 {strides = array<i32>} : memref<1x2x5xf32, #tpu.memory_space<vmem>>, vector<1x1x5xf32>,
    return
  }
  func.func @transform_0(%arg0: i32) -> (i32, i32, i32, i32) {
    %c0_i32 = arith.constant 0 : i32
    %c0_i32_0 = arith.constant 0 : i32
    %c0_i32_1 = arith.constant 0 : i32
    %c0_i32_2 = arith.constant 0 : i32
    return %arg0, %c0_i32, %c0_i32_0, %c0_i32_1 : i32, i32, i32, i32
  }
  func.func @transform_1(%arg0: i32) -> (i32, i32, i32, i32) {
    %c0_i32 = arith.constant 0 : i32
    %c0_i32_0 = arith.constant 0 : i32
    %c0_i32_1 = arith.constant 0 : i32
    %c0_i32_2 = arith.constant 0 : i32
    return %arg0, %c0_i32, %c0_i32_0, %c0_i32_1 : i32, i32, i32, i32
  }
  func.func @transform_2(%arg0: i32) -> (i32, i32, i32, i32) {
    %c0_i32 = arith.constant 0 : i32
    %c0_i32_0 = arith.constant 0 : i32
    %c0_i32_1 = arith.constant 0 : i32
    %c0_i32_2 = arith.constant 0 : i32
    return %arg0, %c0_i32, %c0_i32_0, %c0_i32_1 : i32, i32, i32, i32
  }
  func.func @transform_3(%arg0: i32) -> (i32, i32, i32) {
    %c0_i32 = arith.constant 0 : i32
    %c0_i32_0 = arith.constant 0 : i32
    %c0_i32_1 = arith.constant 0 : i32
    %c0_i32_2 = arith.constant 0 : i32
    return %c0_i32, %c0_i32_0, %c0_i32_1 : i32, i32, i32
  }
  func.func @transform_4(%arg0: i32) -> (i32, i32) {
    %c0_i32 = arith.constant 0 : i32
    %c0_i32_0 = arith.constant 0 : i32
    %c0_i32_1 = arith.constant 0 : i32
    return %c0_i32, %c0_i32_0 : i32, i32
  }
  func.func @transform_5(%arg0: i32) -> (i32, i32, i32) {
    %c0_i32 = arith.constant 0 : i32
    %c0_i32_0 = arith.constant 0 : i32
    %c0_i32_1 = arith.constant 0 : i32
    %c0_i32_2 = arith.constant 0 : i32
    return %c0_i32, %c0_i32_0, %c0_i32_1 : i32, i32, i32
  }
  func.func @transform_6(%arg0: i32) -> (i32, i32) {
    %c0_i32 = arith.constant 0 : i32
    %c0_i32_0 = arith.constant 0 : i32
    %c0_i32_1 = arith.constant 0 : i32
    return %c0_i32, %c0_i32_0 : i32, i32
  }
  func.func @transform_7(%arg0: i32) -> (i32, i32, i32) {
    %c0_i32 = arith.constant 0 : i32
    %c0_i32_0 = arith.constant 0 : i32
    %c0_i32_1 = arith.constant 0 : i32
    %c0_i32_2 = arith.constant 0 : i32
    return %c0_i32, %c0_i32_0, %c0_i32_1 : i32, i32, i32
  }
  func.func @transform_8(%arg0: i32) -> (i32, i32) {
    %c0_i32 = arith.constant 0 : i32
    %c0_i32_0 = arith.constant 0 : i32
    %c0_i32_1 = arith.constant 0 : i32
    return %c0_i32, %c0_i32_0 : i32, i32
  }
  func.func @transform_9(%arg0: i32) -> (i32, i32, i32) {
    %c0_i32 = arith.constant 0 : i32
    %c0_i32_0 = arith.constant 0 : i32
    %c0_i32_1 = arith.constant 0 : i32
    return %arg0, %c0_i32, %c0_i32_0 : i32, i32, i32
  }
}

module attributes {stable_mosaic.version = 11 : i64} {
  func.func @_residual_kernel(%arg0: i32, %arg1: memref<32x128xf32, #tpu.memory_space<vmem>>, %arg2: memref<128x128xf32, #tpu.memory_space<vmem>>, %arg3: memref<1x128xf32, #tpu.memory_space<vmem>>, %arg4: memref<32x128xf32, #tpu.memory_space<vmem>>) attributes {dimension_semantics = [#tpu.dimension_semantics<parallel>], iteration_bounds = array<i64: 1>, scalar_prefetch = 0 : i64, scratch_operands = 0 : i64, tpu.core_type = #tpu.core_type<tc>, window_params = [{pipeline_mode = #tpu.pipeline_mode<synchronous>, transform_indices = @transform_0, window_bounds = array<i64: 32, 128>}, {transform_indices = @transform_1, window_bounds = array<i64: 128, 128>}, {transform_indices = @transform_2, window_bounds = array<i64: 1, 128>}, {transform_indices = @transform_3, window_bounds = array<i64: 32, 128>}]} {
    %c0 = arith.constant 0 : index
    %c0_0 = arith.constant 0 : index
    %0 = vector.load %arg1[%c0, %c0_0] : memref<32x128xf32, #tpu.memory_space<vmem>>, vector<32x128xf32>
    %c0_1 = arith.constant 0 : index
    %c0_2 = arith.constant 0 : index
    %1 = vector.load %arg2[%c0_1, %c0_2] : memref<128x128xf32, #tpu.memory_space<vmem>>, vector<128x128xf32>
    %cst = arith.constant dense<0.000000e+00> : vector<32x128xf32>
    %2 = tpu.matmul %0, %1, %cst {dimension_numbers = #tpu.dot_dimension_numbers<[1], [0], [0], [1], [0, 0, 1, 1], [], []>} : vector<32x128xf32>, vector<128x128xf32>, vector<32x128xf32> -> vector<32x128xf32>
    %c0_3 = arith.constant 0 : index
    %c0_4 = arith.constant 0 : index
    %3 = vector.load %arg3[%c0_3, %c0_4] : memref<1x128xf32, #tpu.memory_space<vmem>>, vector<1x128xf32>
    %4 = vector.broadcast %3 : vector<1x128xf32> to vector<32x128xf32>
    %5 = arith.addf %2, %4 : vector<32x128xf32>
    %c0_5 = arith.constant 0 : index
    %c0_6 = arith.constant 0 : index
    %6 = vector.load %arg4[%c0_5, %c0_6] : memref<32x128xf32, #tpu.memory_space<vmem>>, vector<32x128xf32>
    tpu.vector_store %arg4[%c0_5, %c0_6], %5 {strides = array<i32>} : memref<32x128xf32, #tpu.memory_space<vmem>>, vector<32x128xf32>,
    return
  }
  func.func @transform_0(%arg0: i32) -> (i32, i32) {
    %c0_i32 = arith.constant 0 : i32
    %c0_i32_0 = arith.constant 0 : i32
    %c0_i32_1 = arith.constant 0 : i32
    return %c0_i32, %c0_i32_0 : i32, i32
  }
  func.func @transform_1(%arg0: i32) -> (i32, i32) {
    %c0_i32 = arith.constant 0 : i32
    %c0_i32_0 = arith.constant 0 : i32
    return %c0_i32, %arg0 : i32, i32
  }
  func.func @transform_2(%arg0: i32) -> (i32, i32) {
    %c0_i32 = arith.constant 0 : i32
    %c0_i32_0 = arith.constant 0 : i32
    return %c0_i32, %arg0 : i32, i32
  }
  func.func @transform_3(%arg0: i32) -> (i32, i32) {
    %c0_i32 = arith.constant 0 : i32
    %c0_i32_0 = arith.constant 0 : i32
    return %c0_i32, %arg0 : i32, i32
  }
}

</mosaic_0001>

<bundles_post_ra>
// kernel: baseline_net_forward.2
= control target key start
LH: loop header
LB: loop body
LE: loop exit
PB: predicated region body
PF: predicated region fallthrough
CT: control target
= control target key end

     0   :  { %s336_s1 = inlined_call_operand.vmem [shape: f32[128,128], index: 1, kind: input, shape index: {}]   ;;  %s337_s0 = inlined_call_operand.vmem [shape: f32[32,128], index: 0, kind: input, shape index: {}]   ;;  %s338_s2 = inlined_call_operand.vmem [shape: f32[1,128], index: 2, kind: input, shape index: {}]   ;;  %s339_s3 = inlined_call_operand.vmem [shape: f32[32,128], index: 3, kind: output, shape index: {}]  }
   0x1   :  { %v18_v0 = vld [vmem:[%s336_s1] sm:$0xff]  ;;  %v19_v1 = vld [vmem:[%s336_s1 + $0x8] sm:$0xff]  ;;  %v20_v2 = vld [vmem:[%s336_s1 + $0x10] sm:$0xff] }
   0x2   :  { %v193_v3 = vpack.c.bf16 %v19_v1, %v18_v0  ;;  %v21_v4 = vld [vmem:[%s336_s1 + $0x18] sm:$0xff]  ;;  %v22_v6 = vld [vmem:[%s336_s1 + $0x20] sm:$0xff]  ;;  %v23_v7 = vld [vmem:[%s336_s1 + $0x28] sm:$0xff] }
   0x3   :  { %v197_v5 = vpack.c.bf16 %v21_v4, %v20_v2  ;;  %v201_v8 = vpack.c.bf16 %v23_v7, %v22_v6  ;;  %v14_v9 = vld [vmem:[%s337_s0] sm:$0xff]  ;;  %v16_v10 = vld [vmem:[%s337_s0 + $0x10] sm:$0xff]  ;;  %v25_v12 = vld [vmem:[%s336_s1 + $0x38] sm:$0xff] }
   0x4   :  { %194 = vmatprep.subr.bf16.mxu0 %v193_v3  ;;  %225 = vmatprep.subr.bf16.mxu1 %v193_v3  ;;  %v24_v11 = vld [vmem:[%s336_s1 + $0x30] sm:$0xff]  ;;  %v26_v14 = vld [vmem:[%s336_s1 + $0x40] sm:$0xff]  ;;  %v27_v15 = vld [vmem:[%s336_s1 + $0x48] sm:$0xff] }
   0x5   :  { %196 = vmatpush3.bf16.msra.mxu0 %v193_v3  ;;  %233 = vmatpush3.bf16.msra.mxu1 %v193_v3  ;;  %v205_v13 = vpack.c.bf16 %v25_v12, %v24_v11  ;;  %v209_v16 = vpack.c.bf16 %v27_v15, %v26_v14  ;;  %v28_v17 = vld [vmem:[%s336_s1 + $0x50] sm:$0xff]  ;;  %v29_v18 = vld [vmem:[%s336_s1 + $0x58] sm:$0xff]  ;;  %v30_v20 = vld [vmem:[%s336_s1 + $0x60] sm:$0xff] }
   0x6   :  { %198 = vmatprep.subr.bf16.mxu0 %v197_v5  ;;  %226 = vmatprep.subr.bf16.mxu1 %v197_v5  ;;  %v213_v19 = vpack.c.bf16 %v29_v18, %v28_v17  ;;  %v31_v21 = vld [vmem:[%s336_s1 + $0x68] sm:$0xff]  ;;  %v32_v23 = vld [vmem:[%s336_s1 + $0x70] sm:$0xff]  ;;  %v33_v24 = vld [vmem:[%s336_s1 + $0x78] sm:$0xff] }
   0x7   :  { %187 = vmatprep.mubr.f32.mxu0 %v14_v9  ;;  %190 = vmatprep.mubr.f32.mxu1 %v16_v10  ;;  %v217_v22 = vpack.c.bf16 %v31_v21, %v30_v20  ;;  %v221_v25 = vpack.c.bf16 %v33_v24, %v32_v23  ;;  %v15_v26 = vld [vmem:[%s337_s0 + $0x8] sm:$0xff]  ;;  %v17_v27 = vld [vmem:[%s337_s0 + $0x18] sm:$0xff]  ;;  %v134_v28 = vld [vmem:[%s338_s2] ss:$0 sm:$0xff] }
   0x9   :  { %200 = vmatpush3.bf16.msra.mxu0 %v197_v5  ;;  %234 = vmatpush3.bf16.msra.mxu1 %v197_v5 }
   0xa   :  { %202 = vmatprep.subr.bf16.mxu0 %v201_v8  ;;  %227 = vmatprep.subr.bf16.mxu1 %v201_v8 }
   0xd   :  { %204 = vmatpush3.bf16.msra.mxu0 %v201_v8  ;;  %235 = vmatpush3.bf16.msra.mxu1 %v201_v8 }
   0xe   :  { %206 = vmatprep.subr.bf16.mxu0 %v205_v13  ;;  %228 = vmatprep.subr.bf16.mxu1 %v205_v13 }
  0x11   :  { %208 = vmatpush3.bf16.msra.mxu0 %v205_v13  ;;  %236 = vmatpush3.bf16.msra.mxu1 %v205_v13 }
  0x12   :  { %210 = vmatprep.subr.bf16.mxu0 %v209_v16  ;;  %229 = vmatprep.subr.bf16.mxu1 %v209_v16 }
  0x15   :  { %212 = vmatpush3.bf16.msra.mxu0 %v209_v16  ;;  %237 = vmatpush3.bf16.msra.mxu1 %v209_v16 }
  0x16   :  { %214 = vmatprep.subr.bf16.mxu0 %v213_v19  ;;  %230 = vmatprep.subr.bf16.mxu1 %v213_v19 }
  0x19   :  { %216 = vmatpush3.bf16.msra.mxu0 %v213_v19  ;;  %238 = vmatpush3.bf16.msra.mxu1 %v213_v19 }
  0x1a   :  { %218 = vmatprep.subr.bf16.mxu0 %v217_v22  ;;  %231 = vmatprep.subr.bf16.mxu1 %v217_v22 }
  0x1d   :  { %220 = vmatpush3.bf16.msra.mxu0 %v217_v22  ;;  %239 = vmatpush3.bf16.msra.mxu1 %v217_v22 }
  0x1e   :  { %222 = vmatprep.subr.bf16.mxu0 %v221_v25  ;;  %232 = vmatprep.subr.bf16.mxu1 %v221_v25 }
  0x21   :  { %224 = vmatpush3.bf16.msra.mxu0 %v221_v25  ;;  %240 = vmatpush3.bf16.msra.mxu1 %v221_v25 }
  0x24   :  { %188 = vmatmul.mubr.f32.vlgmr.msra.gmra.mrb[0].mxu0 %v15_v26  ;;  %191 = vmatmul.mubr.f32.vlgmr.msra.gmra.mrb[0].mxu1 %v17_v27 }
  0xf7   :  { %v189_v29 = vpop.f32.mrb[0].mxu0  ;;  %v192_v30 = vpop.f32.mrb[0].mxu1 }
  0xf8   :  { %v113_v31 = vadd.f32 %v189_v29, %v134_v28  ;;  %v123_v32 = vadd.f32 %v192_v30, %v134_v28  ;;  %v107_v33 = vpop.f32.mrb[1].mxu0  ;;  %v117_v34 = vpop.f32.mrb[1].mxu1 }
  0xf9   :  { %v108_v35 = vadd.f32 %v134_v28, %v107_v33  ;;  %v118_v36 = vadd.f32 %v134_v28, %v117_v34 }
  0xfa   :  { %127 = vst [vmem:[%s339_s3 + $0x8] sm:$0xff] %v113_v31  ;;  %129 = vst [vmem:[%s339_s3 + $0x18] sm:$0xff] %v123_v32 }
  0xfb   :  { %126 = vst [vmem:[%s339_s3] sm:$0xff] %v108_v35  ;;  %128 = vst [vmem:[%s339_s3 + $0x10] sm:$0xff] %v118_v36 }

// kernel: baseline_net_forward.3
= control target key start
LH: loop header
LB: loop body
LE: loop exit
PB: predicated region body
PF: predicated region fallthrough
CT: control target
= control target key end

     0   :  { %14 = vsyncpa [#allocation3], 0  ;;  %s2171_s0 = inlined_call_operand.vmem [shape: f32[2,2,8,32], index: 0, kind: input, shape index: {}]   ;;  %s2172_s1 = inlined_call_operand.vmem [shape: f32[2,2,8,31], index: 1, kind: input, shape index: {}]   ;;  %s2173_s2 = inlined_call_operand.vmem [shape: f32[2,2,8,128], index: 2, kind: input, shape index: {}]   ;;  %s2174_s3 = inlined_call_operand.vmem [shape: f32[3,8,8], index: 3, kind: input, shape index: {}]   ;;  %s2175_s4 = inlined_call_operand.vmem [shape: f32[8,1], index: 4, kind: input, shape index: {}]   ;;  %s2176_s5 = inlined_call_operand.vmem [shape: f32[3,8,8], index: 5, kind: input, shape index: {}]   ;;  %s2177_s6 = inlined_call_operand.vmem [shape: f32[8,1], index: 6, kind: input, shape index: {}]   ;;  %s2178_s7 = inlined_call_operand.vmem [shape: f32[5,8,27], index: 7, kind: input, shape index: {}]   ;;  %s2179_s8 = inlined_call_operand.vmem [shape: f32[1,5], index: 8, kind: input, shape index: {}]   ;;  %s2180_s9 = inlined_call_operand.hbm [shape: f32[2,2,5], index: 9, kind: output, shape index: {}]  }
   0x1   :  { %16 = vsyncpa [#allocation3 + $0x1], 0  ;;  %s1914_s30 = smov 0   ;;  %s1916_s10 = smov 0  }
   0x2   :  { %s1918_s11 = smov 0   ;;  %s1920_s12 = smov 0  }
   0x3 LB: > { %s1935_s13 = sadd.s32 4294967295, %s1855_s12   ;;  %s1609_s14 = sadd.s32 4294967294, %s1855_s12   ;;  %s1855_s12 = sphi %s1920_s12, %s2186_s12   ;;  %s1851_s11 = sphi %s1918_s11, %s2185_s11   ;;  %s1847_s10 = sphi %s1916_s10, %s2184_s10   ;;  %s1843_s30 = sphi %s1914_s30, %s2183_s30  }
   0x4   : > { %s1939_s15 = sadd.s32 1, %s1855_s12   ;;  %s233_s16 = sadd.s32 1, %s1851_s11 }
   0x5   : > { %s230_s17 = ssub.s32 %s1855_s12, %s1939_s15  ;;  %p243_p0 = scmp.ne.s32.totalorder %s1851_s11, %s1847_s10 }
   0x6   : > { %p231_p1 = scmp.eq.s32.totalorder %s230_s17, 0  ;;  %p244_p2 = scmp.eq.s32.totalorder %s1935_s13, 1 }
   0x7   : > { %p249_p3 = scmp.ne.s32.totalorder %s1847_s10, %s1843_s30  ;;  %p250_p4 = scmp.eq.s32.totalorder %s1609_s14, 1 }
   0x8   : > { %s1950_s18 = scalar_select %p231_p1, %s1851_s11, %s233_s16  }
   0x9   : > { %p1952_p5 = por %p244_p2, %p243_p0  ;;  %p1956_p6 = por %p250_p4, %p249_p3 }
   0xa   : > { %p1612_p7 = scmp.ge.s32.totalorder %s1855_s12, 1  ;;  %p310_p8 = scmp.lt.s32.totalorder %s1855_s12, 3 }
   0xc   : > { %p311_p9 = pnand %p1612_p7, %p310_p8 }
   0xd   : > { %p356_p10 = scmp.lt.s32.totalorder (!%p311_p9), %s1935_s13, 1  ;;  %v1857_v0 = vmov (!%p311_p9), 0.0   ;;  %vm1858_vm0 = vmmov (!%p311_p9), 0   ;;  %v1859_v1 = vmov (!%p311_p9), 0   ;;  %v1620_v2 = vld [vmem:[%s2174_s3 + $0x8] sm:$0xff] (!%p311_p9)  ;;  %vm376_vm1 = vcmask (!%p311_p9), 64512  }
   0xe   : > { %314 = sbr.rel (%p311_p9) target bundleno = 1523 (0x5f3), region = 56  ;;  %1678 = vmatprep.subr.mxu0 (!%p311_p9), %v1857_v0  ;;  %1680 = vmatprep.mubr.msk.f32.mxu0 (!%p311_p9), %vm1858_vm0, %v1857_v0  ;;  %v1992_v5 = vld [vmem:[%s2174_s3] sm:$0xff] (!%p311_p9)  ;;  %v1623_v7 = vld [vmem:[%s2174_s3 + $0x10] sm:$0xff] (!%p311_p9)  ;;  %s1861_s16 = smov (!%p311_p9), 126   ;;  %v1625_v23 = vld [vmem:[%s2176_s5 + $0x8] sm:$0xff] (!%p311_p9)  ;;  %vm863_vm2 = vcmask (!%p311_p9), 220160  }
   0xf   : > { %1683 = vmatprep.subr.mxu1 (!%p311_p9), %v1857_v0  ;;  %1685 = vmatprep.mubr.msk.f32.mxu1 (!%p311_p9), %vm1858_vm0, %v1857_v0  ;;  %v603_v6 = vld [vmem:[%s2175_s4] sm:$0xff] (!%p311_p9)  ;;  %s1862_s17 = smov (!%p311_p9), 124   ;;  %v1628_v25 = vld [vmem:[%s2176_s5 + $0x10] sm:$0xff] (!%p311_p9)  ;;  %v854_v54 = vld [vmem:[%s2178_s7 + $0x8] sm:$0xff] (!%p311_p9)  ;;  %vm906_vm3 = vcmask (!%p311_p9), 1041409   ;;  %vm908_vm4 = vcmask (!%p311_p9), 1042434  }
  0x10   : > { %1783 = vset.pattern.permute.xlu0 (!%p311_p9), %v1859_v1  ;;  %1784 = vset.pattern.permute.xlu1 (!%p311_p9), %v1859_v1  ;;  %v611_v20 = vld [vmem:[%s2176_s5] sm:$0xff] (!%p311_p9)  ;;  %v855_v57 = vld [vmem:[%s2178_s7 + $0x10] sm:$0xff] (!%p311_p9)  ;;  %v856_v63 = vld [vmem:[%s2178_s7 + $0x18] sm:$0xff] (!%p311_p9)  ;;  %vm910_vm5 = vcmask (!%p311_p9), 1043459   ;;  %vm912_vm6 = vcmask (!%p311_p9), 1044484   ;;  %vm915_vm7 = vcmask (!%p311_p9), 61440  }
  0x11   : > { %v1416_v47 = vld [vmem:[%s2177_s6] sm:$0xff] (!%p311_p9)  ;;  %vm945_vm8 = vcmask (!%p311_p9), 32768   ;;  %s1648_s23 = sshll.u32 (!%p311_p9), %s1935_s13, 5 }
  0x12   : > { %v853_v55 = vld [vmem:[%s2178_s7] sm:$0xff] (!%p311_p9) }
  0x15   : > { %s357_s21 = scalar_select %p356_p10, %s1935_s13, 1 }
  0x16   : > { %s1863_s13 = smov [#allocation2]  }
  0x17   : > { %s1970_s22 = sshll.u32 %s357_s21, 4  ;;  %s1860_s21 = smov 127  }
  0x18   : > { %s1976_s25 = scalar_lea.vmem %s2171_s0, %s1970_s22  ;;  %s1982_s28 = scalar_lea.vmem %s2172_s1, %s1970_s22 }
  0x19   : > { %v371_v3 = vld [vmem:[%s1976_s25] sm:$0xff]  ;;  %v1633_v21 = vld [vmem:[%s1982_s28 + $0x8] sm:$0xff]  ;;  %s2068_s14 = scalar_lea.vmem %s2173_s2, %s1970_s22  ;;  %s1797_s29 = sshll.u32 %s1863_s13, 4  ;;  %s1798_s29 = int_to_ptr.vmem [resolvable:$false] %s1797_s29 }
  0x1a   : > { %v372_v4 = vld [vmem:[%s1982_s28] sm:$0xff]  ;;  %526 = vrot.lane.b32.xlu0 %v371_v3, %s1860_s21  ;;  %1684 = vmatpush3.msra.mxu1 %v371_v3  ;;  %v1632_v22 = vld [vmem:[%s1976_s25 + $0x8] sm:$0xff] }
  0x1b   : > { %1679 = vmatpush3.msra.mxu0 %v372_v4  ;;  %1686 = vmatmul.mubr.msk.f32.vlgmr.msra.gmra.mrb[0].mxu1 %vm376_vm1, %v1992_v5  ;;  %v851_v52 = vld [vmem:[%s2068_s14] sm:$0xff] }
  0x1c   : > { %1681 = vmatmul.mubr.msk.f32.vlgmr.msra.gmra.mrb[0].mxu0 %vm376_vm1, %v1620_v2  ;;  %1688 = vmatprep.subr.mxu0 %v1857_v0 }
  0x1d   : > { %1690 = vmatprep.mubr.msk.f32.mxu0 %vm1858_vm0, %v1857_v0  ;;  %1693 = vmatprep.subr.mxu1 %v1857_v0 }
  0x1e   : > { %606 = vperm.xlu0 %1783, %v603_v6   ;;  %1695 = vmatprep.mubr.msk.f32.mxu1 %vm1858_vm0, %v1857_v0 }
  0x22   : > { %1181 = vperm.xlu0 %1783, %v603_v6  }
  0x8c   : > { %v527_v8 = vpop.permute.xlu0 %526 }
  0x8d   : > { %1689 = vmatpush3.msra.mxu0 %v527_v8 }
  0x8e   : > { %1691 = vmatmul.mubr.msk.f32.vlgmr.msra.gmra.mrb[2].mxu0 %vm376_vm1, %v1623_v7  ;;  %1698 = vmatprep.subr.mxu0 %v1857_v0 }
  0x8f   : > { %1700 = vmatprep.mubr.msk.f32.mxu0 %vm1858_vm0, %v1857_v0 }
  0x9d   : > { %v607_v17 = vpop.permute.xlu0 %606 }
  0xa1   : > { %v1182_v44 = vpop.permute.xlu0 %1181 }
  0xee   : > { %v519_v11 = vpop.f32.mrb[0].mxu1 }
  0xef   : > { %v446_v9 = vpop.f32.mrb[0].mxu0  ;;  %v1687_v13 = vpop.f32.mrb[1].mxu1 }
  0xf0   : > { %v1682_v10 = vpop.f32.mrb[1].mxu0  ;;  %v520_v12 = vadd.f32 %v519_v11, %v446_v9  ;;  %v1644_v13 = vld [vmem:[%s2068_s14 + $0x8] sm:$0xff]  ;;  %s1799_s14 = scalar_lea.vmem %s1798_s29, 64 }
 0x161   : > { %v598_v14 = vpop.f32.mrb[2].mxu0 }
 0x162   : > { %v602_v15 = vadd.f32 %v598_v14, %v520_v12  ;;  %v1692_v16 = vpop.f32.mrb[3].mxu0 }
 0x163   : > { %v857_v16 = vld [vmem:[%s2178_s7 + $0x20] sm:$0xff] }
 0x164   : > { %v609_v18 = vadd.f32 %v607_v17, %v602_v15 }
 0x166   : > { %v610_v19 = vmax.f32 %v609_v18, 0.0 }
 0x168   : > { %615 = vrot.lane.b32.xlu1 %v610_v19, %s1861_s16  ;;  %1699 = vmatpush3.msra.mxu0 %v610_v19 }
 0x169   : > { %1701 = vmatmul.mubr.msk.f32.vlgmr.msra.gmra.mrb[4].mxu0 %vm376_vm1, %v611_v20  ;;  %1708 = vmatprep.subr.mxu0 %v1857_v0 }
 0x16a   : > { %1709 = vmatpush3.msra.mxu0 %v1633_v21  ;;  %1710 = vmatprep.mubr.msk.f32.mxu0 %vm1858_vm0, %v1857_v0 }
 0x16b   : > { %1718 = vmatprep.subr.mxu0 %v1857_v0 }
 0x16c   : > { %766 = vrot.lane.b32.xlu1 %v610_v19, %s1862_s17 }
 0x16d   : > { %1711 = vmatmul.mubr.msk.f32.vlgmr.msra.gmra.mrb[6].mxu0 %vm376_vm1, %v1620_v2 }
 0x16e   : > { %1720 = vmatprep.mubr.msk.f32.mxu0 %vm1858_vm0, %v1857_v0 }
 0x170   : > { %1101 = vrot.lane.b32.xlu1 %v1632_v22, %s1860_s21  ;;  %s2129_s21 = scalar_lea.hbm %s2180_s9, %s1648_s23 }
 0x1da   : > { %v616_v24 = vpop.permute.xlu1 %615 }
 0x1db   : > { %1694 = vmatpush3.msra.mxu1 %v616_v24 }
 0x1dc   : > { %1696 = vmatmul.mubr.msk.f32.vlgmr.msra.gmra.mrb[2].mxu1 %vm376_vm1, %v1625_v23  ;;  %1703 = vmatprep.subr.mxu1 %v1857_v0 }
 0x1dd   : > { %1705 = vmatprep.mubr.msk.f32.mxu1 %vm1858_vm0, %v1857_v0 }
 0x1de   : > { %v767_v26 = vpop.permute.xlu1 %766 }
 0x1df   : > { %1704 = vmatpush3.msra.mxu1 %v767_v26 }
 0x1e0   : > { %1706 = vmatmul.mubr.msk.f32.vlgmr.msra.gmra.mrb[4].mxu1 %vm376_vm1, %v1628_v25  ;;  %1713 = vmatprep.subr.mxu1 %v1857_v0 }
 0x1e1   : > { %1714 = vmatpush3.msra.mxu1 %v1632_v22  ;;  %1715 = vmatprep.mubr.msk.f32.mxu1 %vm1858_vm0, %v1857_v0 }
 0x1e2   : > { %v1102_v27 = vpop.permute.xlu1 %1101  ;;  %1723 = vmatprep.subr.mxu1 %v1857_v0 }
 0x1e3   : > { %1719 = vmatpush3.msra.mxu0 %v1102_v27 }
 0x1e4   : > { %1716 = vmatmul.mubr.msk.f32.vlgmr.msra.gmra.mrb[6].mxu1 %vm376_vm1, %v1992_v5  ;;  %1721 = vmatmul.mubr.msk.f32.vlgmr.msra.gmra.mrb[8].mxu0 %vm376_vm1, %v1623_v7 }
 0x1e5   : > { %1728 = vmatprep.subr.mxu0 %v1857_v0  ;;  %1725 = vmatprep.mubr.msk.f32.mxu1 %vm1858_vm0, %v1857_v0 }
 0x1e6   : > { %1730 = vmatprep.mubr.msk.f32.mxu0 %vm1858_vm0, %v1857_v0 }
 0x23c   : > { %v760_v28 = vpop.f32.mrb[4].mxu0 }
 0x23d   : > { %v1702_v29 = vpop.f32.mrb[5].mxu0 }
 0x240   : > { %v1022_v30 = vpop.f32.mrb[6].mxu0 }
 0x241   : > { %v1712_v31 = vpop.f32.mrb[7].mxu0 }
 0x2af   : > { %v687_v32 = vpop.f32.mrb[2].mxu1 }
 0x2b0   : > { %v761_v33 = vadd.f32 %v760_v28, %v687_v32  ;;  %v1697_v34 = vpop.f32.mrb[3].mxu1 }
 0x2b3   : > { %v838_v35 = vpop.f32.mrb[4].mxu1 }
 0x2b4   : > { %v842_v36 = vadd.f32 %v838_v35, %v761_v33  ;;  %v1707_v37 = vpop.f32.mrb[5].mxu1 }
 0x2b7   : > { %v1095_v38 = vpop.f32.mrb[6].mxu1  ;;  %v1173_v39 = vpop.f32.mrb[8].mxu0 }
 0x2b8   : > { %v1096_v40 = vadd.f32 %v1095_v38, %v1022_v30  ;;  %v1717_v41 = vpop.f32.mrb[7].mxu1  ;;  %v1722_v42 = vpop.f32.mrb[9].mxu0  ;;  %v884_v30 = vlaneseq }
 0x2ba   : > { %v1177_v43 = vadd.f32 %v1173_v39, %v1096_v40  ;;  %v885_v32 = vand.u32 127, %v884_v30  ;;  %v887_v33 = vshrl.u32 %v884_v30, 7 }
 0x2bc   : > { %v1184_v45 = vadd.f32 %v1182_v44, %v1177_v43  ;;  %v2097_v34 = vsub.s32 %v885_v32, %v887_v33 }
 0x2be   : > { %v1185_v46 = vmax.f32 %v1184_v45, 0.0 }
 0x2c0   : > { %1339 = vrot.lane.b32.xlu0 %v1185_v46, %s1862_s17  ;;  %1189 = vrot.lane.b32.xlu1 %v1185_v46, %s1861_s16  ;;  %s353_s16 = sand.u32 1, %s1847_s10  }
 0x2c1   : > { %1729 = vmatpush3.msra.mxu0 %v1185_v46  ;;  %s1613_s17 = sshll.u32 %s353_s16, 1  ;;  %s1513_s26 = scalar_lea.sflag [#allocation3], %s353_s16 }
 0x2c2   : > { %1731 = vmatmul.mubr.msk.f32.vlgmr.msra.gmra.mrb[10].mxu0 %vm376_vm1, %v611_v20  ;;  %s355_s28 = scalar_lea.vmem [#allocation2], %s1613_s17 }
 0x2c3   : > { %s1526_s25 = sshll.u32 %s355_s28, 4  ;;  %s2131_s25 = int_to_ptr.vmem [resolvable:$true] %s1526_s25 }
 0x2c4   : > { %1419 = vperm.xlu0 %1783, %v1416_v47   ;;  %846 = vperm.xlu1 %1784, %v1416_v47   ;;  %s1793_s27 = scalar_lea.vmem %s2131_s25, 32  ;;  %p1800_p0 = scmp.lt.s32.totalorder %s2131_s25, %s1798_s29 }
 0x2c5   : > { %p1794_p11 = scmp.ne.s32.totalorder %s2131_s25, %s1793_s27  ;;  %p1801_p1 = scmp.lt.s32.totalorder %s1799_s14, %s1793_s27 }
 0x2c7   : > { %p1795_p12 = pnand %p1794_p11, %p1952_p5  ;;  %p1802_p2 = por %p1801_p1, %p1800_p0 }
 0x2c9   : > { %p1796_p13 = pneg %p1795_p12 }
 0x2cb   : > { %p1803_p3 = pnand %p1802_p2, %p1796_p13 }
 0x332   : > { %v1190_v48 = vpop.permute.xlu1 %1189  ;;  %v1340_v49 = vpop.permute.xlu0 %1339 }
 0x333   : > { %1724 = vmatpush3.msra.mxu1 %v1190_v48 }
 0x334   : > { %1726 = vmatmul.mubr.msk.f32.vlgmr.msra.gmra.mrb[8].mxu1 %vm376_vm1, %v1625_v23  ;;  %1733 = vmatprep.subr.mxu1 %v1857_v0 }
 0x335   : > { %1734 = vmatpush3.msra.mxu1 %v1340_v49  ;;  %1735 = vmatprep.mubr.msk.f32.mxu1 %vm1858_vm0, %v1857_v0 }
 0x338   : > { %1736 = vmatmul.mubr.msk.f32.vlgmr.msra.gmra.mrb[10].mxu1 %vm376_vm1, %v1628_v25 }
 0x343   : > { %v847_v50 = vpop.permute.xlu1 %846  ;;  %v1420_v11 = vpop.permute.xlu0 %1419 }
 0x344   : > { %v849_v51 = vadd.f32 %v847_v50, %v842_v36 }
 0x346   : > { %v850_v53 = vmax.f32 %v849_v51, 0.0 }
 0x348   : > { %v852_v56 = vadd.f32 %v851_v52, %v850_v53 }
 0x34a   : > { %v859_v58 = vmul.f32 %v854_v54, %v852_v56  ;;  %v858_v59 = vmul.f32 %v853_v55, %v852_v56  ;;  %v860_v62 = vmul.f32 %v855_v57, %v852_v56  ;;  %v861_v1 = vmul.f32 %v856_v63, %v852_v56 }
 0x34b   : > { %v862_v22 = vmul.f32 %v857_v16, %v852_v56 }
 0x34c   : > { %v867_v60 = vsel %vm863_vm2, %v859_v58, 0.0  ;;  %v864_v61 = vsel %vm863_vm2, %v858_v59, 0.0  ;;  %v870_v0 = vsel %vm863_vm2, %v860_v62, 0.0  ;;  %v873_v2 = vsel %vm863_vm2, %v861_v1, 0.0 }
 0x34d   : > { %868 = vadd.xlane.f32.xlu0 %v867_v60  ;;  %865 = vadd.xlane.f32.xlu1 %v864_v61  ;;  %v876_v24 = vsel %vm863_vm2, %v862_v22, 0.0 }
 0x351   : > { %871 = vadd.xlane.f32.xlu0 %v870_v0 }
 0x355   : > { %874 = vadd.xlane.f32.xlu0 %v873_v2 }
 0x395   : > { %v1334_v3 = vpop.f32.mrb[10].mxu0 }
 0x396   : > { %v1732_v4 = vpop.f32.mrb[11].mxu0 }
 0x3da   : > { %v869_v29 = vpop.xlane.xlu0 %868  ;;  %v866_v35 = vpop.xlane.xlu1 %865 }
 0x3db   : > { %v893_v37 = vrot.slane %v869_v29, %v2097_v34  ;;  %v889_v38 = vrot.slane %v866_v35, %v2097_v34 }
 0x3dd   : > { %v907_v43 = vsel %vm906_vm3, %v893_v37, %v889_v38 }
 0x3de   : > { %v872_v31 = vpop.xlane.xlu0 %871 }
 0x3df   : > { %v897_v41 = vrot.slane %v872_v31, %v2097_v34 }
 0x3e1   : > { %v909_v46 = vsel %vm908_vm4, %v897_v41, %v907_v43 }
 0x3e2   : > { %v875_v36 = vpop.xlane.xlu0 %874 }
 0x3e3   : > { %v901_v42 = vrot.slane %v875_v36, %v2097_v34 }
 0x3e5   : > { %v911_v48 = vsel %vm910_vm5, %v901_v42, %v909_v46 }
 0x407   : > { %v1261_v5 = vpop.f32.mrb[8].mxu1 }
 0x408   : > { %v1335_v6 = vadd.f32 %v1334_v3, %v1261_v5  ;;  %v1727_v7 = vpop.f32.mrb[9].mxu1 }
 0x40b   : > { %v1411_v8 = vpop.f32.mrb[10].mxu1 }
 0x40c   : > { %v1415_v9 = vadd.f32 %v1411_v8, %v1335_v6  ;;  %v1737_v10 = vpop.f32.mrb[11].mxu1 }
 0x40e   : > { %v1422_v12 = vadd.f32 %v1420_v11, %v1415_v9 }
 0x410   : > { %v1423_v14 = vmax.f32 %v1422_v12, 0.0 }
 0x412   : > { %v1426_v15 = vadd.f32 %v1644_v13, %v1423_v14 }
 0x414   : > { %v1433_v17 = vmul.f32 %v1426_v15, %v854_v54  ;;  %v1432_v18 = vmul.f32 %v1426_v15, %v853_v55  ;;  %v1434_v21 = vmul.f32 %v1426_v15, %v855_v57  ;;  %v1435_v25 = vmul.f32 %v1426_v15, %v856_v63  ;;  %v1630_v63 = vld [vmem:[%s2179_s8] ss:$0 sm:$0xff] }
 0x415   : > { %v1436_v27 = vmul.f32 %v1426_v15, %v857_v16 }
 0x416   : > { %v1440_v19 = vsel %vm863_vm2, %v1433_v17, 0.0  ;;  %v1437_v20 = vsel %vm863_vm2, %v1432_v18, 0.0  ;;  %v1443_v23 = vsel %vm863_vm2, %v1434_v21, 0.0  ;;  %v1446_v26 = vsel %vm863_vm2, %v1435_v25, 0.0 }
 0x417   : > { %1441 = vadd.xlane.f32.xlu1 %v1440_v19  ;;  %1438 = vadd.xlane.f32.xlu0 %v1437_v20  ;;  %v1449_v28 = vsel %vm863_vm2, %v1436_v27, 0.0 }
 0x41b   : > { %1444 = vadd.xlane.f32.xlu1 %v1443_v23  ;;  %877 = vadd.xlane.f32.xlu0 %v876_v24 }
 0x41f   : > { %1447 = vadd.xlane.f32.xlu1 %v1446_v26 }
 0x423   : > { %1450 = vadd.xlane.f32.xlu1 %v1449_v28 }
 0x4a4   : > { %v1442_v39 = vpop.xlane.xlu1 %1441  ;;  %v1439_v40 = vpop.xlane.xlu0 %1438 }
 0x4a5   : > { %v1464_v50 = vrot.slane %v1442_v39, %v2097_v34  ;;  %v1460_v51 = vrot.slane %v1439_v40, %v2097_v34 }
 0x4a7   : > { %v1477_v56 = vsel %vm906_vm3, %v1464_v50, %v1460_v51 }
 0x4a8   : > { %v1445_v44 = vpop.xlane.xlu1 %1444  ;;  %v878_v45 = vpop.xlane.xlu0 %877 }
 0x4a9   : > { %v905_v47 = vrot.slane %v878_v45, %v2097_v34  ;;  %v1468_v54 = vrot.slane %v1445_v44, %v2097_v34 }
 0x4ab   : > { %v913_v49 = vsel %vm912_vm6, %v905_v47, %v911_v48  ;;  %v1478_v58 = vsel %vm908_vm4, %v1468_v54, %v1477_v56 }
 0x4ac   : > { %v1448_v52 = vpop.xlane.xlu1 %1447  ;;  %v916_v53 = vsel %vm915_vm7, %v913_v49, 0.0 }
 0x4ad   : > { %917 = vadd.xlane.f32.xlu0 %v916_v53  ;;  %v1472_v55 = vrot.slane %v1448_v52, %v2097_v34 }
 0x4af   : > { %v1479_v60 = vsel %vm910_vm5, %v1472_v55, %v1478_v58 }
 0x4b0   : > { %v1451_v57 = vpop.xlane.xlu1 %1450 }
 0x4b1   : > { %v1476_v59 = vrot.slane %v1451_v57, %v2097_v34 }
 0x4b3   : > { %v1480_v61 = vsel %vm912_vm6, %v1476_v59, %v1479_v60 }
 0x4b4   : > { %v1482_v62 = vsel %vm915_vm7, %v1480_v61, 0.0 }
 0x4b5   : > { %1483 = vadd.xlane.f32.xlu1 %v1482_v62 }
 0x4c3   : > { %926 = vbcast.lane.b32.xlu0 %v1630_v63, 256 }
 0x4c6   : > { %1492 = vbcast.lane.b32.xlu1 %v1630_v63, 256 }
 0x53a   : > { %v918_v0 = vpop.xlane.xlu0 %917 }
 0x53e   : > { %v927_v1 = vpop.permute.xlu0 %926 }
 0x53f   : > { %v929_v2 = vadd.f32 %v927_v1, %v918_v0 }
 0x541   : > { %v1631_v3 = vmul.f32 -1.442695, %v929_v2 }
 0x542   : > { %v1484_v4 = vpop.xlane.xlu1 %1483 }
 0x543   : > { %1785 = vpow2.f32 %v1631_v3 }
 0x546   : > { %v1493_v5 = vpop.permute.xlu1 %1492 }
 0x547   : > { %v1495_v6 = vadd.f32 %v1493_v5, %v1484_v4 }
 0x549   : > { %v1646_v7 = vmul.f32 -1.442695, %v1495_v6 }
 0x54b   : > { %1787 = vpow2.f32 %v1646_v7 }
 0x54d   : > { %v1786_v8 = vpop.eup %1785 }
 0x54e   : > { %v933_v9 = vadd.f32 1.0, %v1786_v8 }
 0x550   : > { %1789 = vrcp.f32 %v933_v9 }
 0x555   : > { %v1788_v10 = vpop.eup %1787 }
 0x556   : > { %v1499_v11 = vadd.f32 1.0, %v1788_v10 }
 0x558   : > { %1791 = vrcp.f32 %v1499_v11 }
 0x55a   : > { %v1790_v12 = vpop.eup %1789 }
 0x55b   : > { %938 = vperm.xlu1 %1784, %v1790_v12  }
 0x562   : > { %v1792_v13 = vpop.eup %1791 }
 0x563   : > { %1504 = vperm.xlu0 %1783, %v1792_v13  }
 0x5da   : > { %v939_v14 = vpop.permute.xlu1 %938 }
 0x5db   : > { %v943_v15 = vrot.slane %v939_v14, %v2097_v34 }
 0x5dd   : > { %946 = vst.msk [vmem:[%s355_s28] sm:$0x1] %vm945_vm8, %v943_v15 }
 0x5e2   : > { %v1505_v16 = vpop.permute.xlu0 %1504 }
 0x5e3   : > { %v1509_v17 = vrot.slane %v1505_v16, %v2097_v34 }
 0x5e5   : > { %1511 = vst.msk [vmem:[%s355_s28 + $0x1] sm:$0x1] %vm945_vm8, %v1509_v17 }
 0x5e6   : > { %1806 = shalt.err (!%p1803_p3)
}
 0x5e7   : > { %s1807_s16 = scalar_lea.hbm %s2129_s21, 32  ;;  %s1811_s23 = scalar_lea.hbm %s2180_s9, 64 }
 0x5e8   : > { %p1808_p4 = scmp.ne.s32.totalorder %s2129_s21, %s1807_s16  ;;  %p1812_p9 = scmp.lt.u32.totalorder %s2129_s21, %s2180_s9 }
 0x5e9   : > { %p1813_p10 = scmp.lt.u32.totalorder %s1811_s23, %s1807_s16  ;;  %p1815_p12 = scmp.lt.u32.totalorder %s1807_s16, %s2129_s21 }
 0x5ea   : > { %p1809_p7 = pnand %p1808_p4, %p1952_p5 }
 0x5eb   : > { %p1814_p11 = por %p1813_p10, %p1812_p9 }
 0x5ec   : > { %p1810_p8 = pneg %p1809_p7 }
 0x5ed   : > { %p1816_p13 = por %p1815_p12, %p1814_p11 }
 0x5ef   : > { %p1817_p0 = pnand %p1816_p13, %p1810_p8 }
 0x5f1   : > { %1820 = shalt.err (!%p1817_p0)
}
 0x5f2   : > { %1738 = dma.vmem_to_hbm [thread:$0]  (%p1952_p5), %s2131_s25, 32, %s2129_s21, %s1513_s26  }
 0x5f3 PF: > { %p1744_p1 = scmp.ge.s32.totalorder %s1855_s12, 2  ;;  %s1538_s27 = sand.u32 1, %s1843_s30  }
 0x5f4   : > { %s1539_s13 = scalar_lea.sflag [#allocation3], %s1538_s27 }
 0x5f5   : > { %p1741_p2 = pnand %p1744_p1, %p1956_p6 }
 0x5f7   : > { %1838 = dma.done.wait (!%p1741_p2), %s1539_s13, 32  }
 0x5f8   : > { %1840 = vsyncadd (!%p1741_p2), %s1539_s13, 4294967264  ;;  %p19_p3 = scmp.ge.s32.totalorder %s1939_s15, 4   ;;  %s2183_s30 = smov %s1847_s10 }
 0x5f9   : > { %s2184_s10 = smov %s1851_s11  ;;  %s2185_s11 = smov %s1950_s18 }
 0x5fa   : > { %s2186_s12 = smov %s1939_s15  ;;  %21 = sbr.rel (!%p19_p3) target bundleno = 3 (0x3), region = 104 }
 0x601   :  { %1544 = vsyncpa [#allocation3], 1 }
 0x602   :  { %1546 = vsyncpa [#allocation3 + $0x1], 1 }

</bundles_post_ra>
